<compile_context>
chip_gen: v6e
topology: v6e:2x2x1
jax: 0.10.0
libtpu: 0.0.40
codegen_flags: <defaults>
</compile_context>

<pallas_src>
import functools

import jax
import jax.numpy as jnp
from jax.experimental import pallas as pl
from jax.experimental.pallas import tpu as pltpu

MARGIN = 2.0
EPS = 1e-6       # matches torch.nn.functional.pairwise_distance default eps
NSLOTS = 2       # partial-sum slots; lets v7x's 2 TensorCores split the batch
LANES = 128      # lane-dense output block width


def _contrastive_kernel(o1_ref, o2_ref, lbl_ref, out_ref, acc_ref,
                        *, true_b, tile_b, margin):
    c = pl.program_id(0)            # partial-sum slot ("parallel")
    t = pl.program_id(1)            # batch-tile step within slot ("arbitrary")
    n_t = pl.num_programs(1)

    @pl.when(t == 0)
    def _():
        acc_ref[...] = jnp.zeros_like(acc_ref)

    # Upcast inside the kernel: DMA carries the native (possibly bf16) dtype.
    o1 = o1_ref[...].astype(jnp.float32)                     # (TB, D)
    o2 = o2_ref[...].astype(jnp.float32)                     # (TB, D)
    lbl = lbl_ref[...].astype(jnp.float32)                   # (TB, 1)

    diff = o1 - o2 + EPS                                     # pairwise_distance eps
    dist_sq = jnp.sum(diff * diff, axis=-1, keepdims=True)   # (TB, 1)
    dist = jnp.sqrt(dist_sq)                                 # euclidean distance
    hinge = jnp.maximum(margin - dist, 0.0)                  # clamp(margin - d, 0)
    loss = (1.0 - lbl) * dist_sq + lbl * (hinge * hinge)     # (TB, 1)

    # Mask rows past the true batch (ragged last tile / clamped OOB slots -> 0).
    row0 = (c * n_t + t) * tile_b
    rows = row0 + jax.lax.broadcasted_iota(jnp.int32, (tile_b, 1), 0)
    loss = jnp.where(rows < true_b, loss, 0.0)

    acc_ref[...] += jnp.sum(loss, keepdims=True)             # (1, 1) accumulator

    @pl.when(t == n_t - 1)
    def _():
        # One lane-dense write per slot; wrapper reads lane 0 of each slot.
        out_ref[...] = jnp.broadcast_to(acc_ref[...], (1, LANES))


def contrastive_loss(output1, output2, label, margin=MARGIN):
    B, D = output1.shape
    elem_bytes = jnp.dtype(output1.dtype).itemsize

    # Tile size: ~2 MiB per input tile, rows a multiple of 8, capped at B.
    # (>=512 rows is ~85% of HBM roofline; 2 MiB keeps double-buffered inputs
    #  well under the default scoped-VMEM limit on all of v5e/v6e/v7x.)
    target_bytes = 2 * 1024 * 1024
    tb = max(1, target_bytes // max(1, D * elem_bytes))
    tb = min(tb, B)
    tb = max(8, (tb // 8) * 8)

    n_blocks = pl.cdiv(B, tb)                 # static Python ints
    t_per_slot = pl.cdiv(n_blocks, NSLOTS)
    max_blk = n_blocks - 1

    lbl2d = label.reshape(B, 1)

    def in_map(c, t):
        # Clamp so every block start is in-bounds; over-range tiles are fully
        # masked in-kernel (their global row index is >= B).
        return (jnp.minimum(c * t_per_slot + t, max_blk), 0)

    kernel = functools.partial(
        _contrastive_kernel, true_b=B, tile_b=tb, margin=float(margin))

    partials = pl.pallas_call(
        kernel,
        out_shape=jax.ShapeDtypeStruct((1, NSLOTS * LANES), jnp.float32),
        grid_spec=pltpu.PrefetchScalarGridSpec(
            num_scalar_prefetch=0,
            grid=(NSLOTS, t_per_slot),
            in_specs=[
                pl.BlockSpec((tb, D), in_map),
                pl.BlockSpec((tb, D), in_map),
                pl.BlockSpec((tb, 1), in_map),
            ],
            out_specs=pl.BlockSpec((1, LANES), lambda c, t: (0, c)),
            scratch_shapes=[pltpu.VMEM((1, 1), jnp.float32)],
        ),
        compiler_params=pltpu.CompilerParams(
            dimension_semantics=("parallel", "arbitrary")),
    )(output1, output2, lbl2d)

    total = jnp.sum(partials.reshape(NSLOTS, LANES)[:, 0])
    return total / B


def contrastive_loss_ref(output1, output2, label, margin=MARGIN):
    o1 = output1.astype(jnp.float32)
    o2 = output2.astype(jnp.float32)
    diff = o1 - o2 + EPS
    dist = jnp.sqrt(jnp.sum(diff * diff, axis=-1))
    hinge = jnp.maximum(margin - dist, 0.0)
    return jnp.mean((1.0 - label) * dist ** 2 + label * hinge ** 2)


if __name__ == "__main__":
    key = jax.random.PRNGKey(0)
    k1, k2, k3, k4, k5, k6 = jax.random.split(key, 6)

    # Small f32 case (matches the module's typical siamese-embedding shapes).
    B, D = 8, 32
    output1 = jax.random.normal(k1, (B, D), dtype=jnp.float32)
    output2 = jax.random.normal(k2, (B, D), dtype=jnp.float32)
    label = jax.random.bernoulli(k3, p=0.5, shape=(B,)).astype(jnp.float32)

    loss = jax.block_until_ready(contrastive_loss(output1, output2, label))
    ref = contrastive_loss_ref(output1, output2, label)
    assert jnp.allclose(loss, ref, rtol=1e-5, atol=1e-5), (loss, ref)

    # Ragged batch (not a multiple of the tile), bf16 inputs streamed natively.
    B2, D2 = 300, 32
    o1b = jax.random.normal(k4, (B2, D2), dtype=jnp.bfloat16)
    o2b = jax.random.normal(k5, (B2, D2), dtype=jnp.bfloat16)
    lblb = jax.random.bernoulli(k6, p=0.5, shape=(B2,)).astype(jnp.float32)

    loss2 = jax.block_until_ready(contrastive_loss(o1b, o2b, lblb))
    ref2 = contrastive_loss_ref(o1b, o2b, lblb)
    assert jnp.allclose(loss2, ref2, rtol=1e-4, atol=1e-4), (loss2, ref2)

    print("KERNEL_OK")
</pallas_src>

<mosaic_0001>
module attributes {stable_mosaic.version = 11 : i64} {
  func.func @_contrastive_kernel(%arg0: i32, %arg1: i32, %arg2: memref<8x32xf32, #tpu.memory_space<vmem>>, %arg3: memref<8x32xf32, #tpu.memory_space<vmem>>, %arg4: memref<8x1xf32, #tpu.memory_space<vmem>>, %arg5: memref<1x128xf32, #tpu.memory_space<vmem>>, %arg6: memref<1x1xf32, #tpu.memory_space<vmem>>) attributes {dimension_semantics = [#tpu.dimension_semantics<parallel>, #tpu.dimension_semantics<arbitrary>], iteration_bounds = array<i64: 2, 1>, scalar_prefetch = 0 : i64, scratch_operands = 1 : i64, tpu.core_type = #tpu.core_type<tc>, window_params = [{transform_indices = @transform_0, window_bounds = array<i64: 8, 32>}, {transform_indices = @transform_1, window_bounds = array<i64: 8, 32>}, {transform_indices = @transform_2, window_bounds = array<i64: 8, 1>}, {transform_indices = @transform_3, window_bounds = array<i64: 1, 128>}]} {
    %c0_i32 = arith.constant 0 : i32
    %0 = arith.cmpi eq, %arg1, %c0_i32 : i32
    %1 = arith.extui %0 : i1 to i32
    %c0_i32_0 = arith.constant 0 : i32
    %2 = arith.cmpi ne, %1, %c0_i32_0 : i32
    scf.if %2 {
      %cst_19 = arith.constant 0.000000e+00 : f32
      %44 = vector.broadcast %cst_19 : f32 to vector<1x1xf32>
      %c0_20 = arith.constant 0 : index
      %c0_21 = arith.constant 0 : index
      %45 = vector.load %arg6[%c0_20, %c0_21] : memref<1x1xf32, #tpu.memory_space<vmem>>, vector<1x1xf32>
      tpu.vector_store %arg6[%c0_20, %c0_21], %44 {strides = array<i32>} : memref<1x1xf32, #tpu.memory_space<vmem>>, vector<1x1xf32>,
    } else {
    }
    %c0 = arith.constant 0 : index
    %c0_1 = arith.constant 0 : index
    %3 = vector.load %arg2[%c0, %c0_1] : memref<8x32xf32, #tpu.memory_space<vmem>>, vector<8x32xf32>
    %c0_2 = arith.constant 0 : index
    %c0_3 = arith.constant 0 : index
    %4 = vector.load %arg3[%c0_2, %c0_3] : memref<8x32xf32, #tpu.memory_space<vmem>>, vector<8x32xf32>
    %c0_4 = arith.constant 0 : index
    %c0_5 = arith.constant 0 : index
    %5 = vector.load %arg4[%c0_4, %c0_5] : memref<8x1xf32, #tpu.memory_space<vmem>>, vector<8x1xf32>
    %6 = arith.subf %3, %4 : vector<8x32xf32>
    %cst = arith.constant 9.99999997E-7 : f32
    %7 = vector.broadcast %cst : f32 to vector<8x32xf32>
    %8 = arith.addf %6, %7 : vector<8x32xf32>
    %9 = arith.mulf %8, %8 : vector<8x32xf32>
    %cst_6 = arith.constant dense<0.000000e+00> : vector<8xf32>
    %10 = vector.multi_reduction <add>, %9, %cst_6 [1] : vector<8x32xf32> to vector<8xf32>
    %11 = vector.shape_cast %10 : vector<8xf32> to vector<8x1xf32>
    %12 = math.sqrt %11 : vector<8x1xf32>
    %cst_7 = arith.constant 2.000000e+00 : f32
    %13 = vector.broadcast %cst_7 : f32 to vector<8x1xf32>
    %14 = arith.subf %13, %12 : vector<8x1xf32>
    %cst_8 = arith.constant 0.000000e+00 : f32
    %15 = vector.broadcast %cst_8 : f32 to vector<8x1xf32>
    %16 = arith.maximumf %14, %15 : vector<8x1xf32>
    %cst_9 = arith.constant 1.000000e+00 : f32
    %17 = vector.broadcast %cst_9 : f32 to vector<8x1xf32>
    %18 = arith.subf %17, %5 : vector<8x1xf32>
    %19 = arith.mulf %18, %11 : vector<8x1xf32>
    %20 = arith.mulf %16, %16 : vector<8x1xf32>
    %21 = arith.mulf %5, %20 : vector<8x1xf32>
    %22 = arith.addf %19, %21 : vector<8x1xf32>
    %c1_i32 = arith.constant 1 : i32
    %23 = arith.muli %arg0, %c1_i32 : i32
    %24 = arith.addi %23, %arg1 : i32
    %c8_i32 = arith.constant 8 : i32
    %25 = arith.muli %24, %c8_i32 : i32
    %26 = tpu.iota {dimensions = array<i32: 0>} : vector<8x1xi32>
    %27 = vector.broadcast %25 : i32 to vector<8x1xi32>
    %28 = arith.addi %27, %26 : vector<8x1xi32>
    %c8_i32_10 = arith.constant 8 : i32
    %29 = vector.broadcast %c8_i32_10 : i32 to vector<8x1xi32>
    %30 = arith.cmpi slt, %28, %29 : vector<8x1xi32>
    %cst_11 = arith.constant 0.000000e+00 : f32
    %31 = vector.broadcast %cst_11 : f32 to vector<8x1xf32>
    %32 = arith.select %30, %22, %31 : vector<8x1xi1>, vector<8x1xf32>
    %c0_12 = arith.constant 0 : index
    %c0_13 = arith.constant 0 : index
    %33 = vector.load %arg6[%c0_12, %c0_13] : memref<1x1xf32, #tpu.memory_space<vmem>>, vector<1x1xf32>
    %34 = vector.shape_cast %32 : vector<8x1xf32> to vector<1x8x1xf32>
    %cst_14 = arith.constant dense<0.000000e+00> : vector<1xf32>
    %35 = vector.multi_reduction <add>, %34, %cst_14 [1, 2] : vector<1x8x1xf32> to vector<1xf32>
    %36 = vector.shape_cast %35 : vector<1xf32> to vector<1x1x1xf32>
    %37 = vector.extract %36[0, 0, 0] : f32 from vector<1x1x1xf32>
    %38 = vector.broadcast %37 : f32 to vector<1x1xf32>
    %39 = arith.addf %33, %38 : vector<1x1xf32>
    %c0_15 = arith.constant 0 : index
    %c0_16 = arith.constant 0 : index
    %40 = vector.load %arg6[%c0_15, %c0_16] : memref<1x1xf32, #tpu.memory_space<vmem>>, vector<1x1xf32>
    tpu.vector_store %arg6[%c0_15, %c0_16], %39 {strides = array<i32>} : memref<1x1xf32, #tpu.memory_space<vmem>>, vector<1x1xf32>,
    %c0_i32_17 = arith.constant 0 : i32
    %41 = arith.cmpi eq, %arg1, %c0_i32_17 : i32
    %42 = arith.extui %41 : i1 to i32
    %c0_i32_18 = arith.constant 0 : i32
    %43 = arith.cmpi ne, %42, %c0_i32_18 : i32
    scf.if %43 {
      %c0_19 = arith.constant 0 : index
      %c0_20 = arith.constant 0 : index
      %44 = vector.load %arg6[%c0_19, %c0_20] : memref<1x1xf32, #tpu.memory_space<vmem>>, vector<1x1xf32>
      %45 = vector.shape_cast %44 : vector<1x1xf32> to vector<1x1xf32>
      %46 = vector.broadcast %45 : vector<1x1xf32> to vector<1x128xf32>
      %c0_21 = arith.constant 0 : index
      %c0_22 = arith.constant 0 : index
      %47 = vector.load %arg5[%c0_21, %c0_22] : memref<1x128xf32, #tpu.memory_space<vmem>>, vector<1x128xf32>
      tpu.vector_store %arg5[%c0_21, %c0_22], %46 {strides = array<i32>} : memref<1x128xf32, #tpu.memory_space<vmem>>, vector<1x128xf32>,
    } else {
    }
    return
  }
  func.func @transform_0(%arg0: i32, %arg1: i32) -> (i32, i32) {
    %c1_i32 = arith.constant 1 : i32
    %0 = arith.muli %arg0, %c1_i32 : i32
    %1 = arith.addi %0, %arg1 : i32
    %c0_i32 = arith.constant 0 : i32
    %2 = arith.minsi %1, %c0_i32 : i32
    %c0_i32_0 = arith.constant 0 : i32
    %c0_i32_1 = arith.constant 0 : i32
    return %2, %c0_i32_0 : i32, i32
  }
  func.func @transform_1(%arg0: i32, %arg1: i32) -> (i32, i32) {
    %c1_i32 = arith.constant 1 : i32
    %0 = arith.muli %arg0, %c1_i32 : i32
    %1 = arith.addi %0, %arg1 : i32
    %c0_i32 = arith.constant 0 : i32
    %2 = arith.minsi %1, %c0_i32 : i32
    %c0_i32_0 = arith.constant 0 : i32
    %c0_i32_1 = arith.constant 0 : i32
    return %2, %c0_i32_0 : i32, i32
  }
  func.func @transform_2(%arg0: i32, %arg1: i32) -> (i32, i32) {
    %c1_i32 = arith.constant 1 : i32
    %0 = arith.muli %arg0, %c1_i32 : i32
    %1 = arith.addi %0, %arg1 : i32
    %c0_i32 = arith.constant 0 : i32
    %2 = arith.minsi %1, %c0_i32 : i32
    %c0_i32_0 = arith.constant 0 : i32
    %c0_i32_1 = arith.constant 0 : i32
    return %2, %c0_i32_0 : i32, i32
  }
  func.func @transform_3(%arg0: i32, %arg1: i32) -> (i32, i32) {
    %c0_i32 = arith.constant 0 : i32
    %c0_i32_0 = arith.constant 0 : i32
    return %c0_i32, %arg0 : i32, i32
  }
}

</mosaic_0001>

<bundles_post_ra>
// kernel: tpu_custom_call.1
= control target key start
LH: loop header
LB: loop body
LE: loop exit
PB: predicated region body
PF: predicated region fallthrough
CT: control target
= control target key end

     0   :  { %8 = vsyncpa [#allocation4], 0  ;;  %s893_s0 = inlined_call_operand.vmem [shape: f32[8,32], index: 0, kind: input, shape index: {}]   ;;  %s894_s1 = inlined_call_operand.hbm [shape: f32[8,32], index: 1, kind: input, shape index: {}]   ;;  %s895_s2 = inlined_call_operand.vmem [shape: f32[8,1], index: 2, kind: input, shape index: {}]   ;;  %s896_s3 = inlined_call_operand.hbm [shape: f32[1,256], index: 3, kind: output, shape index: {}]  }
   0x1   :  { %10 = vsyncpa [#allocation4 + $0x1], 0 }
   0x2   :  { %11 = vsyncpa [#allocation5], 0 }
   0x3   :  { %13 = vsyncpa [#allocation5 + $0x1], 0  ;;  %s733_s12 = smov 0   ;;  %s735_s13 = smov 0  }
   0x4   :  { %s737_s14 = smov 0   ;;  %s739_s15 = smov 0  }
   0x5   :  { %s741_s16 = smov 0   ;;  %s743_s17 = smov 0  }
   0x6   :  { %s745_s18 = smov 0   ;;  %s747_s19 = smov 0  }
   0x7 LB: > { %s464_s20 = sadd.s32 4294967295, %s707_s19   ;;  %s465_s21 = sadd.s32 4294967294, %s707_s19   ;;  %s707_s19 = sphi %s747_s19, %s19_s19   ;;  %s703_s18 = sphi %s745_s18, %s915_s18   ;;  %s699_s17 = sphi %s743_s17, %s914_s17   ;;  %s695_s16 = sphi %s741_s16, %s883_s16   ;;  %s691_s15 = sphi %s739_s15, %s913_s15   ;;  %s687_s14 = sphi %s737_s14, %s912_s14   ;;  %s683_s13 = sphi %s735_s13, %s911_s13   ;;  %s679_s12 = sphi %s733_s12, %s910_s12  }
   0x8   : > { %s31_s22 = sadd.s32 1, %s703_s18  ;;  %p676_p1 = scmp.ne.s32.totalorder %s695_s16, 0 }
   0x9   : > { %p33_p0 = scmp.ge.s32.totalorder %s31_s22, 2  ;;  %p84_p2 = scmp.eq.s32.totalorder %s707_s19, 0 }
   0xa   : > { %p89_p3 = scmp.ne.s32.totalorder %s695_s16, %s691_s15  ;;  %p90_p5 = scmp.eq.s32.totalorder %s464_s20, 0 }
   0xb   : > { %s917_s22 = smov (%p33_p0, %s31_s22), 0  ;;  %p779_p4 = por %p676_p1, %p84_p2 }
   0xc   : > { %p783_p6 = por %p90_p5, %p89_p3  ;;  %s131_s25 = ssub.s32 %s703_s18, %s917_s22 }
   0xd   : > { %p132_p7 = scmp.eq.s32.totalorder %s131_s25, 0  ;;  %s134_s26 = sadd.s32 1, %s687_s14 }
   0xe   : > { %s900_s24 = scalar_select %p783_p6, 1, 0 }
   0xf   : > { %s791_s27 = scalar_select %p132_p7, %s687_s14, %s134_s26  }
  0x10   : > { %p144_p8 = scmp.ne.s32.totalorder %s687_s14, %s683_s13  ;;  %p145_p9 = scmp.eq.s32.totalorder %s464_s20, 1 }
  0x11   : > { %p150_p10 = scmp.ne.s32.totalorder %s683_s13, %s679_s12  ;;  %p151_p11 = scmp.eq.s32.totalorder %s465_s21, 1 }
  0x12   : > { %p797_p12 = por %p145_p9, %p144_p8  ;;  %p498_p1 = scmp.lt.s32.totalorder %s707_s19, 2 }
  0x13   : > { %p802_p0 = por %p151_p11, %p150_p10  ;;  %s709_s30 = smov [#allocation3]  }
  0x14   : > { %s901_s28 = scalar_select %p797_p12, 1, 0 }
  0x15   : > { %s902_s29 = scalar_select %p802_p0, 1, 0 }
  0x16   : > { %s198_s4 = sshll.u32 %s709_s30, 4  ;;  %p809_p2 = pnand %p498_p1, %p779_p4  ;;  %s199_s4 = int_to_ptr.vmem [resolvable:$true] %s198_s4 }
  0x17   : > { %s578_s8 = scalar_lea.hbm %s894_s1, 128 }
  0x18   : > { %p579_p7 = scmp.ne.s32.totalorder %s894_s1, %s578_s8  ;;  %p580_p8 = pneg %p809_p2 }
  0x19   : > { %p585_p4 = scmp.lt.s32.totalorder %s578_s8, %s578_s8 }
  0x1a   : > { %p581_p9 = pnand %p580_p8, %p579_p7 }
  0x1c   : > { %p582_p10 = pneg %p581_p9 }
  0x1e   : > { %p587_p11 = pnand %p585_p4, %p582_p10 }
  0x20   : > { %590 = shalt.err (!%p587_p11)
}
  0x21   : > { %s591_s11 = scalar_lea.vmem %s199_s4, 128  ;;  %s598_s15 = scalar_lea.vmem %s199_s4, 256 }
  0x22   : > { %p592_p1 = scmp.ne.s32.totalorder %s199_s4, %s591_s11  ;;  %p599_p5 = scmp.lt.s32.totalorder %s199_s4, %s199_s4 }
  0x23   : > { %p600_p0 = scmp.lt.s32.totalorder %s598_s15, %s591_s11 }
  0x24   : > { %p594_p13 = pnand %p592_p1, %p580_p8 }
  0x25   : > { %p601_p12 = por %p600_p0, %p599_p5 }
  0x26   : > { %p595_p3 = pneg %p594_p13 }
  0x28   : > { %p602_p6 = pnand %p601_p12, %p595_p3 }
  0x2a   : > { %605 = shalt.err (!%p602_p6)
}
  0x2b   : > { %493 = dma.hbm_to_vmem [thread:$0]  (!%p809_p2), %s894_s1, 128, %s199_s4, [#allocation4]  }
  0x2c   : > { %p904_p7 = scmp.lt.s32.totalorder %s707_s19, 3  ;;  %p905_p9 = scmp.ge.s32.totalorder %s707_s19, 1 }
  0x2e   : > { %p217_p10 = pnand %p905_p9, %p904_p7 }
  0x2f   : > { %s222_s23 = sand.u32 (!%p217_p10), 1, %s695_s16   ;;  %p906_p12 = scmp.ne.s32.totalorder (!%p217_p10), %s900_s24, 0 }
  0x30   : > { %220 = sbr.rel (%p217_p10) target bundleno = 587 (0x24b), region = 32  ;;  %s471_s25 = sshll.u32 (!%p217_p10), %s222_s23, 3 }
  0x31   : > { %s223_s26 = scalar_lea.sflag (!%p217_p10), [#allocation4], %s222_s23  ;;  %s226_s30 = scalar_lea.vmem (!%p217_p10), [#allocation3], %s471_s25 }
  0x35   : > { %669 = dma.done.wait (%p906_p12), %s223_s26, 128  }
  0x36   : > { %671 = vsyncadd (%p906_p12), %s223_s26, 4294967168  ;;  %p263_p6 = scmp.lt.s32.totalorder %s699_s17, 0  ;;  %v292_v0 = vld [vmem:[%s226_s30] sm:$0xff]  ;;  %vm297_vm0 = vcmask 261120   ;;  %v317_v8 = vlaneseq  ;;  %s480_s11 = sshll.u32 %s699_s17, 3  ;;  %vm324_vm4 = vcmask 7168  }
  0x37   : > { %v319_v16 = vstv %s480_s11  ;;  %vm289_vm5 = vcmask 0   ;;  %v710_v26 = vmov 0.0   ;;  %v711_v27 = vmov 0   ;;  %s260_s20 = sand.u32 1, %s683_s13   ;;  %s481_s21 = sshll.u32 %s699_s17, 4 }
  0x38   : > { %s264_s5 = scalar_select %p263_p6, %s699_s17, 0  ;;  %v318_v14 = vshrl.u32 %v317_v8, 7  ;;  %290 = vst.msk [vmem:[#allocation2] sm:$0x1] %vm289_vm5, %v710_v26  ;;  %574 = vset.pattern.permute.xlu1 %v711_v27  ;;  %575 = vset.pattern.permute.xlu0 %v711_v27 }
  0x39   : > { %s261_s23 = scalar_lea.vmem [#allocation6], %s260_s20  ;;  %p907_p0 = scmp.ne.s32.totalorder %s901_s28, 0 }
  0x3a   : > { %s919_s5 = smov (!%p263_p6, %s264_s5), 0  ;;  %v320_v19 = vadd.s32 %v319_v16, %v318_v14  ;;  %v350_v39 = vsub.s32 0, %v318_v14  ;;  %s366_s25 = sshll.u32 %s261_s23, 4  ;;  %s367_s25 = int_to_ptr.vmem [resolvable:$true] %s366_s25 }
  0x3b   : > { %s475_s4 = sshll.u32 %s919_s5, 3  ;;  %s364_s5 = scalar_lea.hbm %s896_s3, %s481_s21 }
  0x3c   : > { %s268_s8 = scalar_lea.vmem %s893_s0, %s475_s4  ;;  %s281_s10 = scalar_lea.vmem %s895_s2, %s475_s4  ;;  %vm321_vm3 = vcmp.lt.s32.totalorder %v320_v19, 8 }
  0x3d   : > { %v291_v1 = vld [vmem:[%s268_s8] sm:$0xff]  ;;  %s354_s4 = scalar_lea.sflag [#allocation5], %s260_s20  ;;  %s606_s6 = scalar_lea.vmem %s367_s25, 16 }
  0x3e   : > { %v294_v2 = vsub.f32 %v291_v1, %v292_v0  ;;  %v293_v12 = vld [vmem:[%s281_s10] sm:$0xff]  ;;  %p607_p13 = scmp.ne.s32.totalorder %s367_s25, %s606_s6  ;;  %s712_s7 = smov [#allocation6]  }
  0x3f   : > { %v310_v18 = vsub.f32 1.0, %v293_v12  ;;  %v323_v35 = vld [vmem:[#allocation2] sm:$0x1]  ;;  %s610_s8 = sshll.u32 %s712_s7, 4  ;;  %s611_s8 = int_to_ptr.vmem [resolvable:$false] %s610_s8 }
  0x40   : > { %v295_v3 = vadd.f32 1e-06, %v294_v2  ;;  %p608_p2 = pnand %p607_p13, %p907_p0  ;;  %s612_s17 = scalar_lea.vmem %s611_s8, 32 }
  0x41   : > { %p613_p5 = scmp.lt.s32.totalorder %s367_s25, %s611_s8  ;;  %p614_p8 = scmp.lt.s32.totalorder %s612_s17, %s606_s6 }
  0x42   : > { %v296_v4 = vmul.f32 %v295_v3, %v295_v3  ;;  %p609_p3 = pneg %p608_p2 }
  0x43   : > { %p615_p4 = por %p614_p8, %p613_p5 }
  0x44   : > { %v298_v5 = vsel %vm297_vm0, %v296_v4, 0.0 }
  0x45   : > { %299 = vadd.xlane.f32.xlu0 %v298_v5  ;;  %p616_p11 = pnand %p615_p4, %p609_p3 }
  0xce   : > { %v300_v6 = vpop.xlane.xlu0 %299 }
  0xcf   : > { %576 = vrsqrt.f32 %v300_v6  ;;  %vm303_vm1 = vcmp.eq.f32.partialorder %v300_v6, inf  ;;  %v306_v10 = vand.u32 2147483648, %v300_v6  ;;  %vm305_vm2 = vcmp.eq.f32.partialorder %v300_v6, 0.0 }
  0xd0   : > { %v311_v21 = vmul.f32 %v310_v18, %v300_v6 }
  0xdc   : > { %v577_v7 = vpop.eup %576 }
  0xdd   : > { %v302_v9 = vmul.f32 %v577_v7, %v300_v6 }
  0xdf   : > { %v304_v11 = vsel %vm303_vm1, %v300_v6, %v302_v9 }
  0xe0   : > { %v307_v13 = vsel %vm305_vm2, %v306_v10, %v304_v11 }
  0xe1   : > { %v308_v15 = vsub.f32 2.0, %v307_v13 }
  0xe3   : > { %v309_v17 = vmax.f32 %v308_v15, 0.0 }
  0xe5   : > { %v312_v20 = vmul.f32 %v309_v17, %v309_v17 }
  0xe7   : > { %v313_v22 = vmul.f32 %v312_v20, %v293_v12 }
  0xe9   : > { %v314_v23 = vadd.f32 %v313_v22, %v311_v21 }
  0xeb   : > { %v322_v24 = vsel %vm321_vm3, %v314_v23, 0.0 }
  0xec   : > { %v325_v25 = vsel %vm324_vm4, %v322_v24, 0.0 }
  0xed   : > { %326 = vadd.xlane.f32.xlu0 %v325_v25 }
 0x176   : > { %v327_v28 = vpop.xlane.xlu0 %326 }
 0x177   : > { %v328_v29 = vrot.slane %v327_v28, 4 }
 0x179   : > { %v329_v30 = vadd.f32 %v328_v29, %v327_v28 }
 0x17b   : > { %v330_v31 = vrot.slane %v329_v30, 2 }
 0x17d   : > { %v331_v32 = vadd.f32 %v330_v31, %v329_v30 }
 0x17f   : > { %v332_v33 = vrot.slane %v331_v32, 1 }
 0x181   : > { %v333_v34 = vadd.f32 %v332_v33, %v331_v32 }
 0x183   : > { %484 = vpush %v333_v34 }
 0x1b4   : > { %s485_s15 = spop %484 }
 0x1b5   : > { %v335_v36 = vstv %s485_s15 }
 0x1b6   : > { %v336_v37 = vadd.f32 %v335_v36, %v323_v35 }
 0x1b8   : > { %338 = vst.msk [vmem:[#allocation2] sm:$0x1] %vm289_vm5, %v336_v37 }
 0x1bf   : > { %v342_v38 = vld [vmem:[#allocation2] sm:$0x1] }
 0x1c0   : > { %345 = vperm.xlu1 %574, %v342_v38  }
 0x23b   : > { %v346_v40 = vpop.permute.xlu1 %345 }
 0x23c   : > { %v351_v41 = vrot.slane %v346_v40, %v350_v39 }
 0x23e   : > { %352 = vst [vmem:[%s261_s23] sm:$0x1] %v351_v41 }
 0x23f   : > { %619 = shalt.err (!%p616_p11)
}
 0x240   : > { %s620_s24 = scalar_lea.hbm %s364_s5, 16  ;;  %s624_s11 = scalar_lea.hbm %s896_s3, 32 }
 0x241   : > { %p621_p1 = scmp.ne.s32.totalorder %s364_s5, %s620_s24  ;;  %p625_p10 = scmp.lt.s32.totalorder %s364_s5, %s896_s3 }
 0x242   : > { %p626_p12 = scmp.lt.s32.totalorder %s624_s11, %s620_s24 }
 0x243   : > { %p622_p7 = pnand %p621_p1, %p907_p0 }
 0x244   : > { %p627_p6 = por %p626_p12, %p625_p10 }
 0x245   : > { %p623_p9 = pneg %p622_p7 }
 0x247   : > { %p628_p13 = pnand %p627_p6, %p623_p9 }
 0x249   : > { %631 = shalt.err (!%p628_p13)
}
 0x24a   : > { %488 = dma.vmem_to_hbm [thread:$0]  (%p907_p0), %s367_s25, 16, %s364_s5, %s354_s4  }
 0x24b PF: > { %s378_s21 = sand.u32 1, %s679_s12   ;;  %p908_p2 = scmp.ne.s32.totalorder %s902_s29, 0 }
 0x24c   : > { %p909_p3 = scmp.ge.s32.totalorder %s707_s19, 2  ;;  %s379_s23 = scalar_lea.sflag [#allocation5], %s378_s21 }
 0x24e   : > { %p495_p5 = pnand %p909_p3, %p908_p2 }
 0x250   : > { %p496_p8 = pneg %p495_p5 }
 0x252   : > { %673 = dma.done.wait (%p496_p8), %s379_s23, 16  }
 0x253   : > { %675 = vsyncadd (%p496_p8), %s379_s23, 4294967280  ;;  %s19_s19 = sadd.s32 1, %s707_s19   ;;  %s910_s12 = smov %s683_s13 }
 0x254   : > { %p16_p4 = scmp.ge.s32.totalorder %s19_s19, 4   ;;  %s911_s13 = smov %s687_s14 }
 0x255   : > { %s912_s14 = smov %s791_s27  ;;  %s913_s15 = smov %s695_s16 }
 0x256   : > { %s883_s16 = smov 0   ;;  %s914_s17 = smov %s703_s18 }
 0x257   : > { %s915_s18 = smov %s917_s22  ;;  %18 = sbr.rel (!%p16_p4) target bundleno = 7 (0x7), region = 91 }
 0x25c   :  { %383 = vsyncpa [#allocation4], 1 }
 0x25d   :  { %385 = vsyncpa [#allocation4 + $0x1], 1 }
 0x25e   :  { %386 = vsyncpa [#allocation5], 1 }
 0x25f   :  { %388 = vsyncpa [#allocation5 + $0x1], 1 }

</bundles_post_ra>
